<compile_context>
chip_gen: v7x
topology: tpu7x:2x2x1
jax: 0.10.0
libtpu: 0.0.40
codegen_flags: <defaults>
</compile_context>

<pallas_src>
import functools

import numpy as np

import jax
import jax.numpy as jnp
from jax.experimental import pallas as pl
from jax.experimental.pallas import tpu as pltpu

_LANE = 128
_VMEM_TILE_BUDGET = 20 * 1024 * 1024   # per-grid-step working-set budget
_VMEM_LIMIT_BYTES = 48 * 1024 * 1024   # > 32 MiB default scoped, < v7x 64 MiB physical


def _round_up(x: int, m: int) -> int:
  return (x + m - 1) // m * m


def _pick_batch_tile(batch: int, tb_max: int) -> int:
  """Batch tile for kernels whose 2-D outputs use the tile as second-minor dim.

  Keeps blocks either equal to the full batch or 8-aligned (sublane tile), and
  splits the grid in two when that is possible without breaking alignment so
  v7x's two TensorCores both get work.
  """
  if batch <= tb_max:
    if batch >= 16 and (batch // 2) % 8 == 0:
      return batch // 2          # grid of 2 for v7x megacore
    return batch
  tb = max(8, (tb_max // 8) * 8)
  return min(tb, batch)


# ---------------------------------------------------------------------------
# 1. Bilinear interpolation (F.interpolate, align_corners=False) as 2 matmuls:
#       tmp = x @ Ww^T   (width pass first -> lane-dense intermediate)
#       out = Wh @ tmp   (batched over the images of the group)
# ---------------------------------------------------------------------------
@functools.lru_cache(maxsize=None)
def _interp_matrix_np(in_size: int, out_size: int) -> np.ndarray:
  """PyTorch align_corners=False bilinear resampling matrix [out, in]."""
  scale = in_size / out_size
  dst = np.arange(out_size, dtype=np.float64)
  src = np.maximum((dst + 0.5) * scale - 0.5, 0.0)
  i0 = np.clip(np.floor(src).astype(np.int64), 0, in_size - 1)
  i1 = np.clip(i0 + 1, 0, in_size - 1)
  t = src - i0
  cols = np.arange(in_size)[None, :]
  # When i0 == i1 (clamped edge) the two terms add to 1.0, matching scatter-add.
  m = (cols == i0[:, None]) * (1.0 - t)[:, None] + (cols == i1[:, None]) * t[:, None]
  return m.astype(np.float32)


def _bilinear_kernel(x_ref, wh_ref, wwt_ref, o_ref):
  # x_ref : (G, Hin, Win)  caller dtype (cast in-kernel)
  # wh_ref: (Hout, Hin)    bf16
  # wwt_ref:(Win, Wout)    bf16
  # o_ref : (G, Hout, Wout) bf16
  g, h_out, w_out = o_ref.shape
  _, h_in, w_in = x_ref.shape

  # Width pass first: lane-dense (G*Hin, Wout) intermediate.
  x = x_ref[...].astype(jnp.bfloat16).reshape(g * h_in, w_in)
  tmp = jnp.dot(x, wwt_ref[...], preferred_element_type=jnp.float32)   # (G*Hin, Wout)
  tmp = tmp.astype(jnp.bfloat16).reshape(g, h_in, w_out)

  # Height pass as ONE batched matmul (no unrolled per-image loop / stores).
  wh_b = jnp.broadcast_to(wh_ref[...][None, :, :], (g, h_out, h_in))
  out = jnp.einsum("goh,ghw->gow", wh_b, tmp,
                   preferred_element_type=jnp.float32)                 # (G, Hout, Wout)
  o_ref[...] = out.astype(o_ref.dtype)


def _auto_group(bc, h_in, w_in, h_out, w_out, in_itemsize,
                budget=_VMEM_TILE_BUDGET):
  """Images per grid step, sized to the VMEM budget (v7x-safe)."""
  w_in_p = _round_up(w_in, _LANE)
  w_out_p = _round_up(w_out, _LANE)
  per_img = (2 * h_in * w_in_p * in_itemsize        # input block, double-buffered
             + 2 * h_out * w_out_p * 2              # bf16 output block, double-buffered
             + h_in * w_out_p * (4 + 2)             # width-pass tmp (f32 + bf16 copy)
             + h_out * w_out_p * 4                  # height-pass f32 result pre-cast
             + h_out * _round_up(h_in, _LANE) * 2)  # broadcast Wh
  g = max(1, int(budget // max(per_img, 1)))
  g = min(g, bc, 64)
  if bc >= 2:
    g = min(g, (bc + 1) // 2)                       # grid >= 2 -> both v7x TCs busy
  return max(1, g)


def bilinear_resize(images: jnp.ndarray, out_hw=(224, 224)):
  """images: [B, C, H, W] -> [B, C, out_h, out_w] (align_corners=False), bf16."""
  batch, chan, h_in, w_in = images.shape
  h_out, w_out = out_hw
  # Tiny resampling matrices in bf16 (~0.1-1% deviation vs f32 F.interpolate).
  wh = jnp.asarray(_interp_matrix_np(h_in, h_out), jnp.bfloat16)       # (Hout, Hin)
  wwt = jnp.asarray(_interp_matrix_np(w_in, w_out).T, jnp.bfloat16)    # (Win, Wout)

  bc = batch * chan
  x = images.reshape(bc, h_in, w_in)          # no dtype cast: DMA caller dtype
  g = _auto_group(bc, h_in, w_in, h_out, w_out, x.dtype.itemsize)

  # TODO(synk): if production Win < 128, present a lane-dense input layout
  # instead (the (.., Win) block pads to 128 lanes in VMEM).
  out = pl.pallas_call(
      _bilinear_kernel,
      out_shape=jax.ShapeDtypeStruct((bc, h_out, w_out), jnp.bfloat16),
      grid=(pl.cdiv(bc, g),),
      in_specs=[
          pl.BlockSpec((g, h_in, w_in), lambda i: (i, 0, 0)),
          pl.BlockSpec((h_out, h_in), lambda i: (0, 0)),
          pl.BlockSpec((w_in, w_out), lambda i: (0, 0)),
      ],
      out_specs=pl.BlockSpec((g, h_out, w_out), lambda i: (i, 0, 0)),
      compiler_params=pltpu.CompilerParams(
          dimension_semantics=("parallel",),
          vmem_limit_bytes=_VMEM_LIMIT_BYTES),
  )(x, wh, wwt)
  return out.reshape(batch, chan, h_out, w_out)


# ---------------------------------------------------------------------------
# 2. PostClipProcess + softmax head:
#    clip_output [B, Q, 768] -> cls logits [B, NC], prob of class 1 [B, 1]
# TODO(synk): exact PostClipProcess internals are external; modelled as
#             mean-pool over queries + Linear(embed_dim -> NC).
# ---------------------------------------------------------------------------
def _clip_head_kernel(x_ref, w_ref, b_ref, cls_ref, prob_ref, *, num_classes):
  x = x_ref[...].astype(jnp.float32)                      # (TB, Q, E) cast in-kernel
  pooled = jnp.mean(x, axis=1)                            # (TB, E)
  # w is zero-padded to 128 lanes, bf16 operands + f32 MXU accumulation.
  logits = jnp.dot(pooled.astype(jnp.bfloat16), w_ref[...],
                   preferred_element_type=jnp.float32) + b_ref[...]    # (TB, 128)
  cls_ref[...] = logits

  col = jax.lax.broadcasted_iota(jnp.int32, logits.shape, 1)
  masked = jnp.where(col < num_classes, logits, -jnp.inf)
  m = jnp.max(masked, axis=1, keepdims=True)
  e = jnp.exp(masked - m)                                 # padded lanes -> exactly 0
  denom = jnp.sum(e, axis=1, keepdims=True)
  prob_ref[...] = e * pl.reciprocal(denom, approx=True)   # EUP slot, ~free


def clip_post_process(clip_output, w, b):
  batch, q, e = clip_output.shape
  nc = w.shape[1]
  assert nc <= _LANE, f"num_classes={nc} exceeds lane-padded head width {_LANE}"
  w_pad = jnp.zeros((e, _LANE), jnp.bfloat16).at[:, :nc].set(w.astype(jnp.bfloat16))
  b_pad = jnp.zeros((1, _LANE), jnp.float32).at[:, :nc].set(
      b.astype(jnp.float32).reshape(1, nc))

  tb = _pick_batch_tile(batch, 128)
  cls_pad, prob_pad = pl.pallas_call(
      functools.partial(_clip_head_kernel, num_classes=nc),
      out_shape=(jax.ShapeDtypeStruct((batch, _LANE), jnp.float32),
                 jax.ShapeDtypeStruct((batch, _LANE), jnp.float32)),
      grid=(pl.cdiv(batch, tb),),
      in_specs=[
          pl.BlockSpec((tb, q, e), lambda i: (i, 0, 0)),
          pl.BlockSpec((e, _LANE), lambda i: (0, 0)),
          pl.BlockSpec((1, _LANE), lambda i: (0, 0)),
      ],
      out_specs=(pl.BlockSpec((tb, _LANE), lambda i: (i, 0)),
                 pl.BlockSpec((tb, _LANE), lambda i: (i, 0))),
      compiler_params=pltpu.CompilerParams(
          dimension_semantics=("parallel",)),
  )(clip_output, w_pad, b_pad)       # no wrapper-side cast: DMA caller dtype
  return cls_pad[:, :nc], prob_pad[:, 1:2]


# ---------------------------------------------------------------------------
# 3. MaskPostXrayProcess: xray_pred [B, Q, H, W] + if_boundary [B]
#    -> xray map [B, 1, H, W]
# TODO(synk): exact MaskPostXrayProcess internals are external; modelled as
#             1x1 conv (Q -> 1) + sigmoid, gated by the per-sample boundary flag.
# ---------------------------------------------------------------------------
def _xray_kernel(x_ref, w_ref, bnd_ref, o_ref):
  x = x_ref[...].astype(jnp.float32)                      # (TB, Q, HW) cast in-kernel
  w = w_ref[...].astype(jnp.float32)                      # (Q, 1)
  # VPU broadcast-multiply + sublane reduce over Q (no tiny-K MXU matmul).
  y = jnp.sum(x * w[None, :, :], axis=1)                  # (TB, HW)
  y = jax.nn.sigmoid(y)
  # Vectorized boundary gate: one full-tile multiply + one full-tile store.
  o_ref[...] = (y * bnd_ref[...]).astype(o_ref.dtype)


def _auto_xray_tile(batch, q, hw, in_itemsize, budget=_VMEM_TILE_BUDGET):
  hw_p = _round_up(hw, _LANE)
  per_row = (2 * q * hw_p * in_itemsize                   # input block, double-buffered
             + 2 * hw_p * 4                               # f32 output block, double-buffered
             + q * hw_p * 4 + 2 * hw_p * 4)               # f32 working set
  tb_max = max(1, int(budget // max(per_row, 1)))
  return _pick_batch_tile(batch, min(tb_max, 128))


def masked_xray_post_process(xray_pred, if_boundary, w):
  batch, q, h, w_sp = xray_pred.shape
  hw = h * w_sp
  x = xray_pred.reshape(batch, q, hw)                     # no dtype cast here
  w_col = w.reshape(q, 1).astype(jnp.float32)
  bnd = if_boundary.astype(jnp.float32).reshape(batch, 1)

  tb = _auto_xray_tile(batch, q, hw, x.dtype.itemsize)
  out = pl.pallas_call(
      _xray_kernel,
      out_shape=jax.ShapeDtypeStruct((batch, hw), jnp.float32),
      grid=(pl.cdiv(batch, tb),),
      in_specs=[
          pl.BlockSpec((tb, q, hw), lambda i: (i, 0, 0)),
          pl.BlockSpec((q, 1), lambda i: (0, 0)),
          pl.BlockSpec((tb, 1), lambda i: (i, 0)),        # boundary flags in VMEM
      ],
      out_specs=pl.BlockSpec((tb, hw), lambda i: (i, 0)),
      compiler_params=pltpu.CompilerParams(
          dimension_semantics=("parallel",),
          vmem_limit_bytes=_VMEM_LIMIT_BYTES),
  )(x, w_col, bnd)
  return out.reshape(batch, 1, h, w_sp)


# ---------------------------------------------------------------------------
# DS.forward (inference path), with external backbones replaced by
# deterministic synthetic features.
# ---------------------------------------------------------------------------
def ds_forward(data_dict, params, inference=False):
  images = data_dict["image"]                              # [B, C, H, W]
  clip_images = bilinear_resize(images, (224, 224))        # F.interpolate

  # --- synthetic stand-ins for clip_model / adapter / rec_attn_clip ---
  batch = images.shape[0]
  clip_output = params["synthetic_clip_output"]            # [B, Q, 768]
  xray_pred_raw = params["synthetic_xray_pred"]            # [B, Q, Hx, Wx]
  loss_intra = jnp.float32(0.0)
  loss_clip = jnp.float32(0.0)
  loss_moe = jnp.float32(0.0)

  xray_pred = masked_xray_post_process(
      xray_pred_raw, data_dict["if_boundary"], params["xray_w"])

  clip_cls_output, prob = clip_post_process(
      clip_output, params["head_w"], params["head_b"])
  prob = prob[:, 0]                                        # softmax(...)[:, 1]

  pred_dict = {
      "cls": clip_cls_output,
      "prob": prob,
      "xray_pred": xray_pred,
      "loss_intra": loss_intra,
      "loss_clip": loss_clip,
      "loss_moe": loss_moe,
      "block_features": clip_images,   # placeholder feature passthrough
  }

  if inference:
    prediction_class = jnp.argmax(clip_cls_output, axis=1)
    correct = jnp.sum(prediction_class == data_dict["label"])
    pred_dict["correct"] = correct
    pred_dict["total"] = jnp.int32(batch)

  return pred_dict


if __name__ == "__main__":
  key = jax.random.PRNGKey(0)
  k_img, k_clip, k_xray, k_w, k_b, k_xw = jax.random.split(key, 6)

  B, C, H, W = 2, 3, 16, 16
  Q, E, NC = 8, 768, 2
  Hx, Wx = 16, 16

  data_dict = {
      "image": jax.random.normal(k_img, (B, C, H, W), jnp.float32),
      "if_boundary": jnp.array([1.0, 0.0], jnp.float32),
      "label": jnp.array([1, 0], jnp.int32),
  }

  params = {
      "synthetic_clip_output": jax.random.normal(k_clip, (B, Q, E), jnp.float32),
      "synthetic_xray_pred": jax.random.normal(k_xray, (B, Q, Hx, Wx), jnp.float32),
      "head_w": 0.02 * jax.random.normal(k_w, (E, NC), jnp.float32),
      "head_b": 0.02 * jax.random.normal(k_b, (1, NC), jnp.float32),
      "xray_w": 0.1 * jax.random.normal(k_xw, (1, Q), jnp.float32),
  }

  pred_dict = ds_forward(data_dict, params, inference=True)
  pred_dict = jax.tree_util.tree_map(jax.block_until_ready, pred_dict)

  # NaN checks mirroring DS.forward
  if bool(jnp.isnan(pred_dict["cls"]).any()):
    raise ValueError("Nans found in model output (cls)")
  if bool(jnp.isnan(pred_dict["prob"]).any()):
    raise ValueError("Nans found in model output (prob)")

  assert pred_dict["cls"].shape == (B, NC)
  assert pred_dict["prob"].shape == (B,)
  assert pred_dict["xray_pred"].shape == (B, 1, Hx, Wx)
  assert pred_dict["block_features"].shape == (B, C, 224, 224)

  print("KERNEL_OK")
</pallas_src>

<mosaic_0001>
module attributes {stable_mosaic.version = 11 : i64} {
  func.func @_bilinear_kernel(%arg0: i32, %arg1: memref<3x16x16xf32, #tpu.memory_space<vmem>>, %arg2: memref<224x16xbf16, #tpu.memory_space<vmem>>, %arg3: memref<16x224xbf16, #tpu.memory_space<vmem>>, %arg4: memref<3x224x224xbf16, #tpu.memory_space<vmem>>) attributes {dimension_semantics = [#tpu.dimension_semantics<parallel>], iteration_bounds = array<i64: 2>, scalar_prefetch = 0 : i64, scratch_operands = 0 : i64, tpu.core_type = #tpu.core_type<tc>, window_params = [{transform_indices = @transform_0, window_bounds = array<i64: 3, 16, 16>}, {pipeline_mode = #tpu.pipeline_mode<synchronous>, transform_indices = @transform_1, window_bounds = array<i64: 224, 16>}, {pipeline_mode = #tpu.pipeline_mode<synchronous>, transform_indices = @transform_2, window_bounds = array<i64: 16, 224>}, {transform_indices = @transform_3, window_bounds = array<i64: 3, 224, 224>}]} {
    %c0 = arith.constant 0 : index
    %c0_0 = arith.constant 0 : index
    %c0_1 = arith.constant 0 : index
    %0 = vector.load %arg1[%c0, %c0_0, %c0_1] : memref<3x16x16xf32, #tpu.memory_space<vmem>>, vector<3x16x16xf32>
    %1 = arith.truncf %0 : vector<3x16x16xf32> to vector<3x16x16xbf16>
    %2 = vector.shape_cast %1 : vector<3x16x16xbf16> to vector<48x16xbf16>
    %c0_2 = arith.constant 0 : index
    %c0_3 = arith.constant 0 : index
    %3 = vector.load %arg3[%c0_2, %c0_3] : memref<16x224xbf16, #tpu.memory_space<vmem>>, vector<16x224xbf16>
    %cst = arith.constant dense<0.000000e+00> : vector<48x224xf32>
    %4 = tpu.matmul %2, %3, %cst {dimension_numbers = #tpu.dot_dimension_numbers<[1], [0], [0], [1], [0, 0, 1, 1], [], []>} : vector<48x16xbf16>, vector<16x224xbf16>, vector<48x224xf32> -> vector<48x224xf32>
    %5 = arith.truncf %4 : vector<48x224xf32> to vector<48x224xbf16>
    %6 = vector.shape_cast %5 : vector<48x224xbf16> to vector<3x16x224xbf16>
    %c0_4 = arith.constant 0 : index
    %c0_5 = arith.constant 0 : index
    %7 = vector.load %arg2[%c0_4, %c0_5] : memref<224x16xbf16, #tpu.memory_space<vmem>>, vector<224x16xbf16>
    %8 = vector.shape_cast %7 : vector<224x16xbf16> to vector<1x224x16xbf16>
    %9 = vector.shape_cast %8 : vector<1x224x16xbf16> to vector<1x224x16xbf16>
    %10 = vector.broadcast %9 : vector<1x224x16xbf16> to vector<3x224x16xbf16>
    "tpu.trace_start"() <{level = 10 : i32, message = "goh,ghw->gow"}> : () -> ()
    %cst_6 = arith.constant dense<0.000000e+00> : vector<3x224x224xf32>
    %11 = tpu.matmul %10, %6, %cst_6 {dimension_numbers = #tpu.dot_dimension_numbers<[2], [1], [1], [2], [0, 0, 0, 1, 1, 2], [0], [0]>} : vector<3x224x16xbf16>, vector<3x16x224xbf16>, vector<3x224x224xf32> -> vector<3x224x224xf32>
    "tpu.trace_stop"() : () -> ()
    %12 = arith.truncf %11 : vector<3x224x224xf32> to vector<3x224x224xbf16>
    %c0_7 = arith.constant 0 : index
    %c0_8 = arith.constant 0 : index
    %c0_9 = arith.constant 0 : index
    %13 = vector.load %arg4[%c0_7, %c0_8, %c0_9] : memref<3x224x224xbf16, #tpu.memory_space<vmem>>, vector<3x224x224xbf16>
    tpu.vector_store %arg4[%c0_7, %c0_8, %c0_9], %12 {strides = array<i32>} : memref<3x224x224xbf16, #tpu.memory_space<vmem>>, vector<3x224x224xbf16>,
    return
  }
  func.func @transform_0(%arg0: i32) -> (i32, i32, i32) {
    %c0_i32 = arith.constant 0 : i32
    %c0_i32_0 = arith.constant 0 : i32
    %c0_i32_1 = arith.constant 0 : i32
    return %arg0, %c0_i32, %c0_i32_0 : i32, i32, i32
  }
  func.func @transform_1(%arg0: i32) -> (i32, i32) {
    %c0_i32 = arith.constant 0 : i32
    %c0_i32_0 = arith.constant 0 : i32
    %c0_i32_1 = arith.constant 0 : i32
    return %c0_i32, %c0_i32_0 : i32, i32
  }
  func.func @transform_2(%arg0: i32) -> (i32, i32) {
    %c0_i32 = arith.constant 0 : i32
    %c0_i32_0 = arith.constant 0 : i32
    %c0_i32_1 = arith.constant 0 : i32
    return %c0_i32, %c0_i32_0 : i32, i32
  }
  func.func @transform_3(%arg0: i32) -> (i32, i32, i32) {
    %c0_i32 = arith.constant 0 : i32
    %c0_i32_0 = arith.constant 0 : i32
    %c0_i32_1 = arith.constant 0 : i32
    return %arg0, %c0_i32, %c0_i32_0 : i32, i32, i32
  }
}

</mosaic_0001>

<bundles_post_ra>
// kernel: tpu_custom_call.1
= control target key start
LH: loop header
LB: loop body
LE: loop exit
PB: predicated region body
PF: predicated region fallthrough
CT: control target
= control target key end

     0   :  { %8 = vsyncpa [#allocation3], 0  ;;  %s2522_s0 = inlined_call_operand.vmem [shape: f32[6,16,16], index: 0, kind: input, shape index: {}]   ;;  %s2523_s1 = inlined_call_operand.vmem [shape: bf16[224,16], index: 1, kind: input, shape index: {}]   ;;  %s2524_s2 = inlined_call_operand.vmem [shape: bf16[16,224], index: 2, kind: input, shape index: {}]   ;;  %s2525_s3 = inlined_call_operand.hbm [shape: bf16[6,224,224], index: 3, kind: output, shape index: {}]  }
   0x1   :  { %10 = vsyncpa [#allocation3 + $0x1], 0  ;;  %s1994_s12 = smov 0   ;;  %s1996_s13 = smov 0  }
   0x2   :  { %s1998_s14 = smov 0   ;;  %s2000_s15 = smov 0  }
   0x3 LB: > { %s2015_s16 = sadd.s32 4294967295, %s1968_s15   ;;  %s1603_s17 = sadd.s32 4294967294, %s1968_s15   ;;  %s1968_s15 = sphi %s2000_s15, %s2533_s15   ;;  %s1964_s14 = sphi %s1998_s14, %s2532_s14   ;;  %s1960_s13 = sphi %s1996_s13, %s2531_s13   ;;  %s1956_s12 = sphi %s1994_s12, %s2530_s12  }
   0x4   : > { %s2019_s18 = sadd.s32 1, %s1968_s15   ;;  %s91_s19 = sadd.s32 1, %s1964_s14 }
   0x5   : > { %s88_s20 = ssub.s32 %s1968_s15, %s2019_s18  ;;  %p101_p0 = scmp.ne.s32.totalorder %s1964_s14, %s1960_s13 }
   0x6   : > { %p89_p1 = scmp.eq.s32.totalorder %s88_s20, 0  ;;  %p102_p2 = scmp.eq.s32.totalorder %s2015_s16, 1 }
   0x7   : > { %p107_p3 = scmp.ne.s32.totalorder %s1960_s13, %s1956_s12  ;;  %p108_p4 = scmp.eq.s32.totalorder %s1603_s17, 1 }
   0x8   : > { %s2030_s21 = scalar_select %p89_p1, %s1964_s14, %s91_s19  }
   0x9   : > { %p2032_p5 = por %p102_p2, %p101_p0  ;;  %p2036_p6 = por %p108_p4, %p107_p3 }
   0xa   : > { %p1606_p7 = scmp.ge.s32.totalorder %s1968_s15, 1  ;;  %p142_p8 = scmp.lt.s32.totalorder %s1968_s15, 3 }
   0xc   : > { %p143_p9 = pnand %p1606_p7, %p142_p8 }
   0xd   : > { %v1889_v0 = vld [vmem:[%s2524_s2 + $0x4] ss:$8 sps:$4 sm:$0xff] (!%p143_p9)   ;;  %s167_s26 = smul.u32 (!%p143_p9), 3, %s2015_s16  ;;  %v1891_v1 = vld [vmem:[%s2524_s2] ss:$8 sps:$4 sm:$0xff] (!%p143_p9)   ;;  %v1970_v2 = vmov (!%p143_p9), 0  }
   0xe   : > { %146 = sbr.rel (%p143_p9) target bundleno = 656 (0x290), region = 32  ;;  %239 = vmatprep.mubr.bf16.mxu0 (!%p143_p9), %v1970_v2  ;;  %498 = vmatprep.mubr.bf16.mxu1 (!%p143_p9), %v1970_v2  ;;  %vm197_vm0 = vcmask (!%p143_p9), 130048   ;;  %v2063_v18 = vld [vmem:[%s2523_s1] sm:$0xff] (!%p143_p9)   ;;  %v2068_v19 = vld [vmem:[%s2523_s1 + $0x28] sm:$0xff] (!%p143_p9)   ;;  %v2079_v26 = vld [vmem:[%s2523_s1 + $0x30] sm:$0xff] (!%p143_p9)   ;;  %s164_s25 = sand.u32 (!%p143_p9), 1, %s1960_s13  }
   0xf   : > { %207 = vmatprep.subr.bf16.mxu0 (!%p143_p9), %v1889_v0  ;;  %p168_p10 = scmp.lt.s32.totalorder (!%p143_p9), %s167_s26, 5  ;;  %v1898_v27 = vld [vmem:[%s2523_s1 + $0x8] sm:$0xff] (!%p143_p9)   ;;  %v2092_v34 = vld [vmem:[%s2523_s1 + $0x38] sm:$0xff] (!%p143_p9)   ;;  %v1900_v35 = vld [vmem:[%s2523_s1 + $0x10] sm:$0xff] (!%p143_p9)   ;;  %vm1439_vm1 = vcmask (!%p143_p9), 1043456   ;;  %vm1440_vm2 = vcmask (!%p143_p9), 785412  }
  0x10   : > { %208 = vmatpush1.bf16.msra.mxu0 (!%p143_p9), %v1891_v1  ;;  %v2105_v36 = vld [vmem:[%s2523_s1 + $0x40] sm:$0xff] (!%p143_p9)   ;;  %v1902_v37 = vld [vmem:[%s2523_s1 + $0x18] sm:$0xff] (!%p143_p9)   ;;  %v1897_v38 = vld [vmem:[%s2523_s1 + $0x48] sm:$0xff] (!%p143_p9)   ;;  %s1852_s28 = smul.u32 (!%p143_p9), 10752, %s2015_s16  ;;  %s2481_s16 = scalar_lea.sflag (!%p143_p9), [#allocation3], %s164_s25 }
  0x11   : > { %v1904_v39 = vld [vmem:[%s2523_s1 + $0x20] sm:$0xff] (!%p143_p9)   ;;  %v1899_v40 = vld [vmem:[%s2523_s1 + $0x50] sm:$0xff] (!%p143_p9)   ;;  %v1901_v41 = vld [vmem:[%s2523_s1 + $0x58] sm:$0xff] (!%p143_p9)   ;;  %s1971_s7 = smov (!%p143_p9), [#allocation2]  }
  0x12   : > { %v1903_v42 = vld [vmem:[%s2523_s1 + $0x60] sm:$0xff] (!%p143_p9)   ;;  %v1905_v43 = vld [vmem:[%s2523_s1 + $0x68] sm:$0xff] (!%p143_p9)   ;;  %vm2212_vm3 = vmor (!%p143_p9), %vm1440_vm2, %vm1439_vm1  ;;  %s1910_s8 = sshll.u32 (!%p143_p9), %s1971_s7, 4  ;;  %s1911_s8 = int_to_ptr.vmem [resolvable:$false] %s1910_s8 }
  0x13   : > { %s1912_s9 = scalar_lea.vmem (!%p143_p9), %s1911_s8, 21504 }
  0x15   : > { %s2535_s26 = smov (!%p168_p10, %s167_s26), 5 }
  0x16   : > { %s1757_s29 = sshll.u32 %s2535_s26, 4  ;;  %s1844_s26 = smul.u32 672, %s164_s25 }
  0x17   : > { %s172_s5 = scalar_lea.vmem %s2522_s0, %s1757_s29 }
  0x18   : > { %v176_v3 = vld [vmem:[%s172_s5] sm:$0xff]  ;;  %v177_v4 = vld [vmem:[%s172_s5 + $0x8] sm:$0xff]  ;;  %v178_v6 = vld [vmem:[%s172_s5 + $0x10] sm:$0xff]  ;;  %s2216_s27 = scalar_lea.vmem [#allocation2], %s1844_s26 }
  0x19   : > { %v182_v5 = vpack.c.bf16 %v177_v4, %v176_v3  ;;  %v179_v7 = vld [vmem:[%s172_s5 + $0x18] sm:$0xff]  ;;  %v180_v9 = vld [vmem:[%s172_s5 + $0x20] sm:$0xff]  ;;  %v181_v10 = vld [vmem:[%s172_s5 + $0x28] sm:$0xff]  ;;  %s1541_s29 = sshll.u32 %s2216_s27, 4  ;;  %s2469_s5 = scalar_lea.hbm %s2525_s3, %s1852_s28  ;;  %s2471_s29 = int_to_ptr.vmem [resolvable:$true] %s1541_s29 }
  0x1a   : > { %v183_v8 = vpack.c.bf16 %v179_v7, %v178_v6  ;;  %v184_v11 = vpack.c.bf16 %v181_v10, %v180_v9  ;;  %s1906_s6 = scalar_lea.vmem %s2471_s29, 10752  ;;  %p1913_p0 = scmp.lt.s32.totalorder %s2471_s29, %s1911_s8 }
  0x1b   : > { %1611 = vmatmul.mubr.msk.bf16.vlgmr.msra.gmra.mrb[0].mxu0 %vm197_vm0, %v182_v5  ;;  %p1907_p11 = scmp.ne.s32.totalorder %s2471_s29, %s1906_s6  ;;  %p1914_p1 = scmp.lt.s32.totalorder %s1912_s9, %s1906_s6 }
  0x1c   : > { %249 = vmatprep.mubr.bf16.mxu0 %v1970_v2 }
  0x1d   : > { %p1908_p12 = pnand %p1907_p11, %p2032_p5  ;;  %p1915_p2 = por %p1914_p1, %p1913_p0 }
  0x1f   : > { %p1909_p13 = pneg %p1908_p12 }
  0x21   : > { %p1916_p3 = pnand %p1915_p2, %p1909_p13 }
  0x23   : > { %1612 = vmatmul.mubr.msk.bf16.gmra.mrb[4].mxu0 %vm197_vm0, %v183_v8 }
  0x24   : > { %259 = vmatprep.mubr.bf16.mxu0 %v1970_v2 }
  0x2b   : > { %1613 = vmatmul.mubr.msk.bf16.gmra.mrb[8].mxu0 %vm197_vm0, %v184_v11 }
  0x2c   : > { %448 = vmatprep.mubr.bf16.mxu0 %v1970_v2 }
  0xee   : > { %v241_v12 = vpop.f32.mrb[0].mxu0 }
  0xef   : > { %v243_v13 = vpop.f32.mrb[1].mxu0 }
  0xf0   : > { %v245_v14 = vpop.f32.mrb[2].mxu0 }
  0xf1   : > { %v270_v15 = vpack.c.bf16 %v245_v14, %v241_v12  ;;  %v247_v16 = vpop.f32.mrb[3].mxu0 }
  0xf2   : > { %v271_v17 = vpack.c.bf16 %v247_v16, %v243_v13 }
  0xf4   : > { %416 = vmatprep.subr.bf16.mxu0 %v271_v17  ;;  %1842 = vmatprep.subr.bf16.mxu1 %v271_v17 }
  0xf5   : > { %417 = vmatpush1.bf16.msra.mxu0 %v270_v15  ;;  %1843 = vmatpush1.bf16.msra.mxu1 %v270_v15 }
  0xf6   : > { %v251_v20 = vpop.f32.mrb[4].mxu0 }
  0xf7   : > { %v253_v21 = vpop.f32.mrb[5].mxu0 }
  0xf8   : > { %v255_v22 = vpop.f32.mrb[6].mxu0  ;;  %1628 = vmatmul.mubr.msk.bf16.vlgmr.msra.gmra.mrb[12].mxu0 %vm197_vm0, %v2063_v18  ;;  %1633 = vmatmul.mubr.msk.bf16.vlgmr.msra.gmra.mrb[0].mxu1 %vm197_vm0, %v2068_v19 }
  0xf9   : > { %v272_v23 = vpack.c.bf16 %v255_v22, %v251_v20  ;;  %v257_v24 = vpop.f32.mrb[7].mxu0  ;;  %508 = vmatprep.mubr.bf16.mxu1 %v1970_v2  ;;  %458 = vmatprep.mubr.bf16.mxu0 %v1970_v2 }
  0xfa   : > { %v273_v25 = vpack.c.bf16 %v257_v24, %v253_v21 }
  0xfc   : > { %589 = vmatprep.subr.bf16.mxu0 %v273_v25 }
  0xfd   : > { %590 = vmatpush1.bf16.msra.mxu0 %v272_v23 }
  0xfe   : > { %v261_v28 = vpop.f32.mrb[8].mxu0 }
  0xff   : > { %v263_v29 = vpop.f32.mrb[9].mxu0 }
 0x100   : > { %v265_v30 = vpop.f32.mrb[10].mxu0  ;;  %1634 = vmatmul.mubr.msk.bf16.gmra.mrb[4].mxu1 %vm197_vm0, %v2079_v26  ;;  %1629 = vmatmul.mubr.msk.bf16.gmra.mrb[16].mxu0 %vm197_vm0, %v1898_v27 }
 0x101   : > { %v274_v31 = vpack.c.bf16 %v265_v30, %v261_v28  ;;  %v267_v32 = vpop.f32.mrb[11].mxu0  ;;  %518 = vmatprep.mubr.bf16.mxu1 %v1970_v2  ;;  %468 = vmatprep.mubr.bf16.mxu0 %v1970_v2 }
 0x102   : > { %v275_v33 = vpack.c.bf16 %v267_v32, %v263_v29 }
 0x104   : > { %762 = vmatprep.subr.bf16.mxu1 %v275_v33 }
 0x105   : > { %763 = vmatpush1.bf16.msra.mxu1 %v274_v31 }
 0x108   : > { %1635 = vmatmul.mubr.msk.bf16.gmra.mrb[8].mxu1 %vm197_vm0, %v2092_v34  ;;  %1630 = vmatmul.mubr.msk.bf16.gmra.mrb[20].mxu0 %vm197_vm0, %v1900_v35 }
 0x109   : > { %528 = vmatprep.mubr.bf16.mxu1 %v1970_v2  ;;  %478 = vmatprep.mubr.bf16.mxu0 %v1970_v2 }
 0x110   : > { %1636 = vmatmul.mubr.msk.bf16.gmra.mrb[12].mxu1 %vm197_vm0, %v2105_v36  ;;  %1631 = vmatmul.mubr.msk.bf16.gmra.mrb[24].mxu0 %vm197_vm0, %v1902_v37 }
 0x111   : > { %538 = vmatprep.mubr.bf16.mxu1 %v1970_v2  ;;  %488 = vmatprep.mubr.bf16.mxu0 %v1970_v2 }
 0x118   : > { %1637 = vmatmul.mubr.msk.bf16.gmra.mrb[16].mxu1 %vm197_vm0, %v1897_v38  ;;  %1632 = vmatmul.mubr.msk.bf16.gmra.mrb[28].mxu0 %vm197_vm0, %v1904_v39 }
 0x119   : > { %548 = vmatprep.mubr.bf16.mxu1 %v1970_v2  ;;  %621 = vmatprep.mubr.bf16.mxu0 %v1970_v2 }
 0x120   : > { %1638 = vmatmul.mubr.msk.bf16.gmra.mrb[20].mxu1 %vm197_vm0, %v1899_v40  ;;  %1642 = vmatmul.mubr.msk.bf16.vlgmr.msra.gmra.mrb[32].mxu0 %vm197_vm0, %v2063_v18 }
 0x121   : > { %558 = vmatprep.mubr.bf16.mxu1 %v1970_v2  ;;  %631 = vmatprep.mubr.bf16.mxu0 %v1970_v2 }
 0x128   : > { %1639 = vmatmul.mubr.msk.bf16.gmra.mrb[24].mxu1 %vm197_vm0, %v1901_v41  ;;  %1643 = vmatmul.mubr.msk.bf16.gmra.mrb[36].mxu0 %vm197_vm0, %v1898_v27 }
 0x129   : > { %568 = vmatprep.mubr.bf16.mxu1 %v1970_v2  ;;  %641 = vmatprep.mubr.bf16.mxu0 %v1970_v2 }
 0x130   : > { %1640 = vmatmul.mubr.msk.bf16.gmra.mrb[28].mxu1 %vm197_vm0, %v1903_v42  ;;  %1644 = vmatmul.mubr.msk.bf16.gmra.mrb[40].mxu0 %vm197_vm0, %v1900_v35 }
 0x131   : > { %578 = vmatprep.mubr.bf16.mxu1 %v1970_v2  ;;  %651 = vmatprep.mubr.bf16.mxu0 %v1970_v2 }
 0x138   : > { %1641 = vmatmul.mubr.msk.bf16.gmra.mrb[32].mxu1 %vm197_vm0, %v1905_v43  ;;  %1645 = vmatmul.mubr.msk.bf16.gmra.mrb[44].mxu0 %vm197_vm0, %v1902_v37 }
 0x139   : > { %794 = vmatprep.mubr.bf16.mxu1 %v1970_v2  ;;  %661 = vmatprep.mubr.bf16.mxu0 %v1970_v2 }
 0x140   : > { %1656 = vmatmul.mubr.msk.bf16.vlgmr.msra.gmra.mrb[36].mxu1 %vm197_vm0, %v2063_v18  ;;  %1646 = vmatmul.mubr.msk.bf16.gmra.mrb[48].mxu0 %vm197_vm0, %v1904_v39 }
 0x141   : > { %804 = vmatprep.mubr.bf16.mxu1 %v1970_v2  ;;  %671 = vmatprep.mubr.bf16.mxu0 %v1970_v2 }
 0x148   : > { %1657 = vmatmul.mubr.msk.bf16.gmra.mrb[40].mxu1 %vm197_vm0, %v1898_v27  ;;  %1647 = vmatmul.mubr.msk.bf16.gmra.mrb[52].mxu0 %vm197_vm0, %v2068_v19 }
 0x149   : > { %814 = vmatprep.mubr.bf16.mxu1 %v1970_v2  ;;  %681 = vmatprep.mubr.bf16.mxu0 %v1970_v2 }
 0x150   : > { %1658 = vmatmul.mubr.msk.bf16.gmra.mrb[44].mxu1 %vm197_vm0, %v1900_v35  ;;  %1648 = vmatmul.mubr.msk.bf16.gmra.mrb[56].mxu0 %vm197_vm0, %v2079_v26 }
 0x151   : > { %824 = vmatprep.mubr.bf16.mxu1 %v1970_v2  ;;  %691 = vmatprep.mubr.bf16.mxu0 %v1970_v2 }
 0x158   : > { %1659 = vmatmul.mubr.msk.bf16.gmra.mrb[48].mxu1 %vm197_vm0, %v1902_v37  ;;  %1649 = vmatmul.mubr.msk.bf16.gmra.mrb[60].mxu0 %vm197_vm0, %v2092_v34 }
 0x159   : > { %834 = vmatprep.mubr.bf16.mxu1 %v1970_v2  ;;  %701 = vmatprep.mubr.bf16.mxu0 %v1970_v2 }
 0x160   : > { %1660 = vmatmul.mubr.msk.bf16.gmra.mrb[52].mxu1 %vm197_vm0, %v1904_v39  ;;  %1650 = vmatmul.mubr.msk.bf16.gmra.mrb[64].mxu0 %vm197_vm0, %v2105_v36 }
 0x161   : > { %844 = vmatprep.mubr.bf16.mxu1 %v1970_v2  ;;  %711 = vmatprep.mubr.bf16.mxu0 %v1970_v2 }
 0x168   : > { %1661 = vmatmul.mubr.msk.bf16.gmra.mrb[56].mxu1 %vm197_vm0, %v2068_v19  ;;  %1651 = vmatmul.mubr.msk.bf16.gmra.mrb[68].mxu0 %vm197_vm0, %v1897_v38 }
 0x169   : > { %854 = vmatprep.mubr.bf16.mxu1 %v1970_v2  ;;  %721 = vmatprep.mubr.bf16.mxu0 %v1970_v2 }
 0x170   : > { %1662 = vmatmul.mubr.msk.bf16.gmra.mrb[60].mxu1 %vm197_vm0, %v2079_v26  ;;  %1652 = vmatmul.mubr.msk.bf16.gmra.mrb[72].mxu0 %vm197_vm0, %v1899_v40 }
 0x171   : > { %864 = vmatprep.mubr.bf16.mxu1 %v1970_v2  ;;  %731 = vmatprep.mubr.bf16.mxu0 %v1970_v2 }
 0x178   : > { %1663 = vmatmul.mubr.msk.bf16.gmra.mrb[64].mxu1 %vm197_vm0, %v2092_v34  ;;  %1653 = vmatmul.mubr.msk.bf16.gmra.mrb[76].mxu0 %vm197_vm0, %v1901_v41 }
 0x179   : > { %874 = vmatprep.mubr.bf16.mxu1 %v1970_v2  ;;  %741 = vmatprep.mubr.bf16.mxu0 %v1970_v2 }
 0x180   : > { %1664 = vmatmul.mubr.msk.bf16.gmra.mrb[68].mxu1 %vm197_vm0, %v2105_v36  ;;  %1654 = vmatmul.mubr.msk.bf16.gmra.mrb[80].mxu0 %vm197_vm0, %v1903_v42 }
 0x181   : > { %884 = vmatprep.mubr.bf16.mxu1 %v1970_v2  ;;  %751 = vmatprep.mubr.bf16.mxu0 %v1970_v2 }
 0x188   : > { %1665 = vmatmul.mubr.msk.bf16.gmra.mrb[72].mxu1 %vm197_vm0, %v1897_v38  ;;  %1655 = vmatmul.mubr.msk.bf16.gmra.mrb[84].mxu0 %vm197_vm0, %v1905_v43 }
 0x189   : > { %894 = vmatprep.mubr.bf16.mxu1 %v1970_v2 }
 0x190   : > { %1666 = vmatmul.mubr.msk.bf16.gmra.mrb[76].mxu1 %vm197_vm0, %v1899_v40 }
 0x191   : > { %904 = vmatprep.mubr.bf16.mxu1 %v1970_v2 }
 0x198   : > { %1667 = vmatmul.mubr.msk.bf16.gmra.mrb[80].mxu1 %vm197_vm0, %v1901_v41 }
 0x199   : > { %914 = vmatprep.mubr.bf16.mxu1 %v1970_v2 }
 0x1a0   : > { %1668 = vmatmul.mubr.msk.bf16.gmra.mrb[84].mxu1 %vm197_vm0, %v1903_v42 }
 0x1a1   : > { %924 = vmatprep.mubr.bf16.mxu1 %v1970_v2 }
 0x1a8   : > { %1669 = vmatmul.mubr.msk.bf16.gmra.mrb[88].mxu1 %vm197_vm0, %v1905_v43 }
 0x1cb   : > { %v500_v44 = vpop.f32.mrb[0].mxu1  ;;  %v450_v45 = vpop.f32.mrb[12].mxu0 }
 0x1cc   : > { %v502_v46 = vpop.f32.mrb[1].mxu1  ;;  %v452_v48 = vpop.f32.mrb[13].mxu0 }
 0x1cd   : > { %v1768_v49 = vpack.c.bf16 %v502_v46, %v500_v44  ;;  %v504_v50 = vpop.f32.mrb[2].mxu1  ;;  %v1758_v51 = vpack.c.bf16 %v452_v48, %v450_v45  ;;  %v454_v52 = vpop.f32.mrb[14].mxu0 }
 0x1ce   : > { %v506_v53 = vpop.f32.mrb[3].mxu1  ;;  %v456_v54 = vpop.f32.mrb[15].mxu0 }
 0x1cf   : > { %1452 = vst.msk [vmem:[%s2216_s27 + $0x50] sm:$0xff] %vm2212_vm3, %v1768_v49  ;;  %v1769_v55 = vpack.c.bf16 %v506_v53, %v504_v50  ;;  %1442 = vst.msk [vmem:[%s2216_s27] sm:$0xff] %vm2212_vm3, %v1758_v51  ;;  %v1759_v56 = vpack.c.bf16 %v456_v54, %v454_v52 }
 0x1d1   : > { %1453 = vst.msk [vmem:[%s2216_s27 + $0x58] sm:$0xff] %vm2212_vm3, %v1769_v55  ;;  %1443 = vst.msk [vmem:[%s2216_s27 + $0x8] sm:$0xff] %vm2212_vm3, %v1759_v56 }
 0x1d3   : > { %v510_v57 = vpop.f32.mrb[4].mxu1  ;;  %v460_v58 = vpop.f32.mrb[16].mxu0 }
 0x1d4   : > { %v512_v59 = vpop.f32.mrb[5].mxu1  ;;  %v462_v60 = vpop.f32.mrb[17].mxu0 }
 0x1d5   : > { %v1770_v61 = vpack.c.bf16 %v512_v59, %v510_v57  ;;  %v514_v62 = vpop.f32.mrb[6].mxu1  ;;  %v1760_v63 = vpack.c.bf16 %v462_v60, %v460_v58  ;;  %v464_v0 = vpop.f32.mrb[18].mxu0 }
 0x1d6   : > { %v516_v1 = vpop.f32.mrb[7].mxu1  ;;  %v466_v2 = vpop.f32.mrb[19].mxu0 }
 0x1d7   : > { %1454 = vst.msk [vmem:[%s2216_s27 + $0x60] sm:$0xff] %vm2212_vm3, %v1770_v61  ;;  %v1771_v3 = vpack.c.bf16 %v516_v1, %v514_v62  ;;  %1444 = vst.msk [vmem:[%s2216_s27 + $0x10] sm:$0xff] %vm2212_vm3, %v1760_v63  ;;  %v1761_v4 = vpack.c.bf16 %v466_v2, %v464_v0 }
 0x1d9   : > { %1455 = vst.msk [vmem:[%s2216_s27 + $0x68] sm:$0xff] %vm2212_vm3, %v1771_v3  ;;  %1445 = vst.msk [vmem:[%s2216_s27 + $0x18] sm:$0xff] %vm2212_vm3, %v1761_v4 }
 0x1db   : > { %v520_v5 = vpop.f32.mrb[8].mxu1  ;;  %v470_v6 = vpop.f32.mrb[20].mxu0 }
 0x1dc   : > { %v522_v7 = vpop.f32.mrb[9].mxu1  ;;  %v472_v8 = vpop.f32.mrb[21].mxu0 }
 0x1dd   : > { %v1772_v9 = vpack.c.bf16 %v522_v7, %v520_v5  ;;  %v524_v10 = vpop.f32.mrb[10].mxu1  ;;  %v1762_v11 = vpack.c.bf16 %v472_v8, %v470_v6  ;;  %v474_v12 = vpop.f32.mrb[22].mxu0 }
 0x1de   : > { %v526_v13 = vpop.f32.mrb[11].mxu1  ;;  %v476_v14 = vpop.f32.mrb[23].mxu0 }
 0x1df   : > { %1456 = vst.msk [vmem:[%s2216_s27 + $0x70] sm:$0xff] %vm2212_vm3, %v1772_v9  ;;  %v1773_v15 = vpack.c.bf16 %v526_v13, %v524_v10  ;;  %1446 = vst.msk [vmem:[%s2216_s27 + $0x20] sm:$0xff] %vm2212_vm3, %v1762_v11  ;;  %v1763_v16 = vpack.c.bf16 %v476_v14, %v474_v12 }
 0x1e1   : > { %1457 = vst.msk [vmem:[%s2216_s27 + $0x78] sm:$0xff] %vm2212_vm3, %v1773_v15  ;;  %1447 = vst.msk [vmem:[%s2216_s27 + $0x28] sm:$0xff] %vm2212_vm3, %v1763_v16 }
 0x1e3   : > { %v530_v17 = vpop.f32.mrb[12].mxu1  ;;  %v480_v18 = vpop.f32.mrb[24].mxu0 }
 0x1e4   : > { %v532_v19 = vpop.f32.mrb[13].mxu1  ;;  %v482_v20 = vpop.f32.mrb[25].mxu0 }
 0x1e5   : > { %v1774_v21 = vpack.c.bf16 %v532_v19, %v530_v17  ;;  %v534_v22 = vpop.f32.mrb[14].mxu1  ;;  %v1764_v23 = vpack.c.bf16 %v482_v20, %v480_v18  ;;  %v484_v24 = vpop.f32.mrb[26].mxu0 }
 0x1e6   : > { %v536_v25 = vpop.f32.mrb[15].mxu1  ;;  %v486_v26 = vpop.f32.mrb[27].mxu0 }
 0x1e7   : > { %1458 = vst.msk [vmem:[%s2216_s27 + $0x80] sm:$0xff] %vm2212_vm3, %v1774_v21  ;;  %v1775_v27 = vpack.c.bf16 %v536_v25, %v534_v22  ;;  %1448 = vst.msk [vmem:[%s2216_s27 + $0x30] sm:$0xff] %vm2212_vm3, %v1764_v23  ;;  %v1765_v28 = vpack.c.bf16 %v486_v26, %v484_v24 }
 0x1e9   : > { %1459 = vst.msk [vmem:[%s2216_s27 + $0x88] sm:$0xff] %vm2212_vm3, %v1775_v27  ;;  %1449 = vst.msk [vmem:[%s2216_s27 + $0x38] sm:$0xff] %vm2212_vm3, %v1765_v28 }
 0x1eb   : > { %v540_v29 = vpop.f32.mrb[16].mxu1  ;;  %v490_v30 = vpop.f32.mrb[28].mxu0 }
 0x1ec   : > { %v542_v31 = vpop.f32.mrb[17].mxu1  ;;  %v492_v32 = vpop.f32.mrb[29].mxu0 }
 0x1ed   : > { %v1776_v33 = vpack.c.bf16 %v542_v31, %v540_v29  ;;  %v544_v34 = vpop.f32.mrb[18].mxu1  ;;  %v1766_v35 = vpack.c.bf16 %v492_v32, %v490_v30  ;;  %v494_v36 = vpop.f32.mrb[30].mxu0 }
 0x1ee   : > { %v546_v37 = vpop.f32.mrb[19].mxu1  ;;  %v496_v38 = vpop.f32.mrb[31].mxu0 }
 0x1ef   : > { %1460 = vst.msk [vmem:[%s2216_s27 + $0x90] sm:$0xff] %vm2212_vm3, %v1776_v33  ;;  %v1777_v39 = vpack.c.bf16 %v546_v37, %v544_v34  ;;  %1450 = vst.msk [vmem:[%s2216_s27 + $0x40] sm:$0xff] %vm2212_vm3, %v1766_v35  ;;  %v1767_v40 = vpack.c.bf16 %v496_v38, %v494_v36 }
 0x1f1   : > { %1461 = vst.msk [vmem:[%s2216_s27 + $0x98] sm:$0xff] %vm2212_vm3, %v1777_v39  ;;  %1451 = vst.msk [vmem:[%s2216_s27 + $0x48] sm:$0xff] %vm2212_vm3, %v1767_v40 }
 0x1f3   : > { %v550_v41 = vpop.f32.mrb[20].mxu1  ;;  %v623_v42 = vpop.f32.mrb[32].mxu0 }
 0x1f4   : > { %v552_v43 = vpop.f32.mrb[21].mxu1  ;;  %v625_v44 = vpop.f32.mrb[33].mxu0 }
 0x1f5   : > { %v1778_v45 = vpack.c.bf16 %v552_v43, %v550_v41  ;;  %v554_v46 = vpop.f32.mrb[22].mxu1  ;;  %v1786_v48 = vpack.c.bf16 %v625_v44, %v623_v42  ;;  %v627_v49 = vpop.f32.mrb[34].mxu0 }
 0x1f6   : > { %v556_v50 = vpop.f32.mrb[23].mxu1  ;;  %v629_v51 = vpop.f32.mrb[35].mxu0 }
 0x1f7   : > { %1462 = vst.msk [vmem:[%s2216_s27 + $0xa0] sm:$0xff] %vm2212_vm3, %v1778_v45  ;;  %v1779_v52 = vpack.c.bf16 %v556_v50, %v554_v46  ;;  %1470 = vst.msk [vmem:[%s2216_s27 + $0xe0] sm:$0xff] %vm2212_vm3, %v1786_v48  ;;  %v1787_v53 = vpack.c.bf16 %v629_v51, %v627_v49 }
 0x1f9   : > { %1463 = vst.msk [vmem:[%s2216_s27 + $0xa8] sm:$0xff] %vm2212_vm3, %v1779_v52  ;;  %1471 = vst.msk [vmem:[%s2216_s27 + $0xe8] sm:$0xff] %vm2212_vm3, %v1787_v53 }
 0x1fb   : > { %v560_v54 = vpop.f32.mrb[24].mxu1  ;;  %v633_v55 = vpop.f32.mrb[36].mxu0 }
 0x1fc   : > { %v562_v56 = vpop.f32.mrb[25].mxu1  ;;  %v635_v57 = vpop.f32.mrb[37].mxu0 }
 0x1fd   : > { %v1780_v58 = vpack.c.bf16 %v562_v56, %v560_v54  ;;  %v564_v59 = vpop.f32.mrb[26].mxu1  ;;  %v1788_v60 = vpack.c.bf16 %v635_v57, %v633_v55  ;;  %v637_v61 = vpop.f32.mrb[38].mxu0 }
 0x1fe   : > { %v566_v62 = vpop.f32.mrb[27].mxu1  ;;  %v639_v63 = vpop.f32.mrb[39].mxu0 }
 0x1ff   : > { %1464 = vst.msk [vmem:[%s2216_s27 + $0xb0] sm:$0xff] %vm2212_vm3, %v1780_v58  ;;  %v1781_v0 = vpack.c.bf16 %v566_v62, %v564_v59  ;;  %1472 = vst.msk [vmem:[%s2216_s27 + $0xf0] sm:$0xff] %vm2212_vm3, %v1788_v60  ;;  %v1789_v1 = vpack.c.bf16 %v639_v63, %v637_v61 }
 0x201   : > { %1465 = vst.msk [vmem:[%s2216_s27 + $0xb8] sm:$0xff] %vm2212_vm3, %v1781_v0  ;;  %1473 = vst.msk [vmem:[%s2216_s27 + $0xf8] sm:$0xff] %vm2212_vm3, %v1789_v1 }
 0x203   : > { %v570_v2 = vpop.f32.mrb[28].mxu1  ;;  %v643_v3 = vpop.f32.mrb[40].mxu0 }
 0x204   : > { %v572_v4 = vpop.f32.mrb[29].mxu1  ;;  %v645_v5 = vpop.f32.mrb[41].mxu0 }
 0x205   : > { %v1782_v6 = vpack.c.bf16 %v572_v4, %v570_v2  ;;  %v574_v7 = vpop.f32.mrb[30].mxu1  ;;  %v1790_v8 = vpack.c.bf16 %v645_v5, %v643_v3  ;;  %v647_v9 = vpop.f32.mrb[42].mxu0 }
 0x206   : > { %v576_v10 = vpop.f32.mrb[31].mxu1  ;;  %v649_v11 = vpop.f32.mrb[43].mxu0 }
 0x207   : > { %1466 = vst.msk [vmem:[%s2216_s27 + $0xc0] sm:$0xff] %vm2212_vm3, %v1782_v6  ;;  %v1783_v12 = vpack.c.bf16 %v576_v10, %v574_v7  ;;  %1474 = vst.msk [vmem:[%s2216_s27 + $0x100] sm:$0xff] %vm2212_vm3, %v1790_v8  ;;  %v1791_v13 = vpack.c.bf16 %v649_v11, %v647_v9 }
 0x209   : > { %1467 = vst.msk [vmem:[%s2216_s27 + $0xc8] sm:$0xff] %vm2212_vm3, %v1783_v12  ;;  %1475 = vst.msk [vmem:[%s2216_s27 + $0x108] sm:$0xff] %vm2212_vm3, %v1791_v13 }
 0x20b   : > { %v580_v14 = vpop.f32.mrb[32].mxu1  ;;  %v653_v15 = vpop.f32.mrb[44].mxu0 }
 0x20c   : > { %v582_v16 = vpop.f32.mrb[33].mxu1  ;;  %v655_v17 = vpop.f32.mrb[45].mxu0 }
 0x20d   : > { %v1784_v18 = vpack.c.bf16 %v582_v16, %v580_v14  ;;  %v584_v19 = vpop.f32.mrb[34].mxu1  ;;  %v1792_v20 = vpack.c.bf16 %v655_v17, %v653_v15  ;;  %v657_v21 = vpop.f32.mrb[46].mxu0 }
 0x20e   : > { %v586_v22 = vpop.f32.mrb[35].mxu1  ;;  %v659_v23 = vpop.f32.mrb[47].mxu0 }
 0x20f   : > { %1468 = vst.msk [vmem:[%s2216_s27 + $0xd0] sm:$0xff] %vm2212_vm3, %v1784_v18  ;;  %v1785_v24 = vpack.c.bf16 %v586_v22, %v584_v19  ;;  %1476 = vst.msk [vmem:[%s2216_s27 + $0x110] sm:$0xff] %vm2212_vm3, %v1792_v20  ;;  %v1793_v25 = vpack.c.bf16 %v659_v23, %v657_v21 }
 0x211   : > { %1469 = vst.msk [vmem:[%s2216_s27 + $0xd8] sm:$0xff] %vm2212_vm3, %v1785_v24  ;;  %1477 = vst.msk [vmem:[%s2216_s27 + $0x118] sm:$0xff] %vm2212_vm3, %v1793_v25 }
 0x213   : > { %v796_v26 = vpop.f32.mrb[36].mxu1  ;;  %v663_v27 = vpop.f32.mrb[48].mxu0 }
 0x214   : > { %v798_v28 = vpop.f32.mrb[37].mxu1  ;;  %v665_v29 = vpop.f32.mrb[49].mxu0 }
 0x215   : > { %v1814_v30 = vpack.c.bf16 %v798_v28, %v796_v26  ;;  %v800_v31 = vpop.f32.mrb[38].mxu1  ;;  %v1794_v32 = vpack.c.bf16 %v665_v29, %v663_v27  ;;  %v667_v33 = vpop.f32.mrb[50].mxu0 }
 0x216   : > { %v802_v34 = vpop.f32.mrb[39].mxu1  ;;  %v669_v35 = vpop.f32.mrb[51].mxu0 }
 0x217   : > { %1498 = vst.msk [vmem:[%s2216_s27 + $0x1c0] sm:$0xff] %vm2212_vm3, %v1814_v30  ;;  %v1815_v36 = vpack.c.bf16 %v802_v34, %v800_v31  ;;  %1478 = vst.msk [vmem:[%s2216_s27 + $0x120] sm:$0xff] %vm2212_vm3, %v1794_v32  ;;  %v1795_v37 = vpack.c.bf16 %v669_v35, %v667_v33 }
 0x219   : > { %1499 = vst.msk [vmem:[%s2216_s27 + $0x1c8] sm:$0xff] %vm2212_vm3, %v1815_v36  ;;  %1479 = vst.msk [vmem:[%s2216_s27 + $0x128] sm:$0xff] %vm2212_vm3, %v1795_v37 }
 0x21b   : > { %v806_v38 = vpop.f32.mrb[40].mxu1  ;;  %v673_v39 = vpop.f32.mrb[52].mxu0 }
 0x21c   : > { %v808_v40 = vpop.f32.mrb[41].mxu1  ;;  %v675_v41 = vpop.f32.mrb[53].mxu0 }
 0x21d   : > { %v1816_v42 = vpack.c.bf16 %v808_v40, %v806_v38  ;;  %v810_v43 = vpop.f32.mrb[42].mxu1  ;;  %v1796_v44 = vpack.c.bf16 %v675_v41, %v673_v39  ;;  %v677_v45 = vpop.f32.mrb[54].mxu0 }
 0x21e   : > { %v812_v46 = vpop.f32.mrb[43].mxu1  ;;  %v679_v48 = vpop.f32.mrb[55].mxu0 }
 0x21f   : > { %1500 = vst.msk [vmem:[%s2216_s27 + $0x1d0] sm:$0xff] %vm2212_vm3, %v1816_v42  ;;  %v1817_v49 = vpack.c.bf16 %v812_v46, %v810_v43  ;;  %1480 = vst.msk [vmem:[%s2216_s27 + $0x130] sm:$0xff] %vm2212_vm3, %v1796_v44  ;;  %v1797_v50 = vpack.c.bf16 %v679_v48, %v677_v45 }
 0x221   : > { %1501 = vst.msk [vmem:[%s2216_s27 + $0x1d8] sm:$0xff] %vm2212_vm3, %v1817_v49  ;;  %1481 = vst.msk [vmem:[%s2216_s27 + $0x138] sm:$0xff] %vm2212_vm3, %v1797_v50 }
 0x223   : > { %v816_v51 = vpop.f32.mrb[44].mxu1  ;;  %v683_v52 = vpop.f32.mrb[56].mxu0 }
 0x224   : > { %v818_v53 = vpop.f32.mrb[45].mxu1  ;;  %v685_v54 = vpop.f32.mrb[57].mxu0 }
 0x225   : > { %v1818_v55 = vpack.c.bf16 %v818_v53, %v816_v51  ;;  %v820_v56 = vpop.f32.mrb[46].mxu1  ;;  %v1798_v57 = vpack.c.bf16 %v685_v54, %v683_v52  ;;  %v687_v58 = vpop.f32.mrb[58].mxu0 }
 0x226   : > { %v822_v59 = vpop.f32.mrb[47].mxu1  ;;  %v689_v60 = vpop.f32.mrb[59].mxu0 }
 0x227   : > { %1502 = vst.msk [vmem:[%s2216_s27 + $0x1e0] sm:$0xff] %vm2212_vm3, %v1818_v55  ;;  %v1819_v61 = vpack.c.bf16 %v822_v59, %v820_v56  ;;  %1482 = vst.msk [vmem:[%s2216_s27 + $0x140] sm:$0xff] %vm2212_vm3, %v1798_v57  ;;  %v1799_v62 = vpack.c.bf16 %v689_v60, %v687_v58 }
 0x229   : > { %1503 = vst.msk [vmem:[%s2216_s27 + $0x1e8] sm:$0xff] %vm2212_vm3, %v1819_v61  ;;  %1483 = vst.msk [vmem:[%s2216_s27 + $0x148] sm:$0xff] %vm2212_vm3, %v1799_v62 }
 0x22b   : > { %v826_v63 = vpop.f32.mrb[48].mxu1  ;;  %v693_v0 = vpop.f32.mrb[60].mxu0 }
 0x22c   : > { %v828_v1 = vpop.f32.mrb[49].mxu1  ;;  %v695_v2 = vpop.f32.mrb[61].mxu0 }
 0x22d   : > { %v1820_v3 = vpack.c.bf16 %v828_v1, %v826_v63  ;;  %v830_v4 = vpop.f32.mrb[50].mxu1  ;;  %v1800_v5 = vpack.c.bf16 %v695_v2, %v693_v0  ;;  %v697_v6 = vpop.f32.mrb[62].mxu0 }
 0x22e   : > { %v832_v7 = vpop.f32.mrb[51].mxu1  ;;  %v699_v8 = vpop.f32.mrb[63].mxu0 }
 0x22f   : > { %1504 = vst.msk [vmem:[%s2216_s27 + $0x1f0] sm:$0xff] %vm2212_vm3, %v1820_v3  ;;  %v1821_v9 = vpack.c.bf16 %v832_v7, %v830_v4  ;;  %1484 = vst.msk [vmem:[%s2216_s27 + $0x150] sm:$0xff] %vm2212_vm3, %v1800_v5  ;;  %v1801_v10 = vpack.c.bf16 %v699_v8, %v697_v6 }
 0x231   : > { %1505 = vst.msk [vmem:[%s2216_s27 + $0x1f8] sm:$0xff] %vm2212_vm3, %v1821_v9  ;;  %1485 = vst.msk [vmem:[%s2216_s27 + $0x158] sm:$0xff] %vm2212_vm3, %v1801_v10 }
 0x233   : > { %v836_v11 = vpop.f32.mrb[52].mxu1  ;;  %v703_v12 = vpop.f32.mrb[64].mxu0 }
 0x234   : > { %v838_v13 = vpop.f32.mrb[53].mxu1  ;;  %v705_v14 = vpop.f32.mrb[65].mxu0 }
 0x235   : > { %v1822_v15 = vpack.c.bf16 %v838_v13, %v836_v11  ;;  %v840_v16 = vpop.f32.mrb[54].mxu1  ;;  %v1802_v17 = vpack.c.bf16 %v705_v14, %v703_v12  ;;  %v707_v18 = vpop.f32.mrb[66].mxu0 }
 0x236   : > { %v842_v19 = vpop.f32.mrb[55].mxu1  ;;  %v709_v20 = vpop.f32.mrb[67].mxu0 }
 0x237   : > { %1506 = vst.msk [vmem:[%s2216_s27 + $0x200] sm:$0xff] %vm2212_vm3, %v1822_v15  ;;  %v1823_v21 = vpack.c.bf16 %v842_v19, %v840_v16  ;;  %1486 = vst.msk [vmem:[%s2216_s27 + $0x160] sm:$0xff] %vm2212_vm3, %v1802_v17  ;;  %v1803_v22 = vpack.c.bf16 %v709_v20, %v707_v18 }
 0x239   : > { %1507 = vst.msk [vmem:[%s2216_s27 + $0x208] sm:$0xff] %vm2212_vm3, %v1823_v21  ;;  %1487 = vst.msk [vmem:[%s2216_s27 + $0x168] sm:$0xff] %vm2212_vm3, %v1803_v22 }
 0x23b   : > { %v846_v23 = vpop.f32.mrb[56].mxu1  ;;  %v713_v24 = vpop.f32.mrb[68].mxu0 }
 0x23c   : > { %v848_v25 = vpop.f32.mrb[57].mxu1  ;;  %v715_v26 = vpop.f32.mrb[69].mxu0 }
 0x23d   : > { %v1824_v27 = vpack.c.bf16 %v848_v25, %v846_v23  ;;  %v850_v28 = vpop.f32.mrb[58].mxu1  ;;  %v1804_v29 = vpack.c.bf16 %v715_v26, %v713_v24  ;;  %v717_v30 = vpop.f32.mrb[70].mxu0 }
 0x23e   : > { %v852_v31 = vpop.f32.mrb[59].mxu1  ;;  %v719_v32 = vpop.f32.mrb[71].mxu0 }
 0x23f   : > { %1508 = vst.msk [vmem:[%s2216_s27 + $0x210] sm:$0xff] %vm2212_vm3, %v1824_v27  ;;  %v1825_v33 = vpack.c.bf16 %v852_v31, %v850_v28  ;;  %1488 = vst.msk [vmem:[%s2216_s27 + $0x170] sm:$0xff] %vm2212_vm3, %v1804_v29  ;;  %v1805_v34 = vpack.c.bf16 %v719_v32, %v717_v30 }
 0x241   : > { %1509 = vst.msk [vmem:[%s2216_s27 + $0x218] sm:$0xff] %vm2212_vm3, %v1825_v33  ;;  %1489 = vst.msk [vmem:[%s2216_s27 + $0x178] sm:$0xff] %vm2212_vm3, %v1805_v34 }
 0x243   : > { %v856_v35 = vpop.f32.mrb[60].mxu1  ;;  %v723_v36 = vpop.f32.mrb[72].mxu0 }
 0x244   : > { %v858_v37 = vpop.f32.mrb[61].mxu1  ;;  %v725_v38 = vpop.f32.mrb[73].mxu0 }
 0x245   : > { %v1826_v39 = vpack.c.bf16 %v858_v37, %v856_v35  ;;  %v860_v40 = vpop.f32.mrb[62].mxu1  ;;  %v1806_v41 = vpack.c.bf16 %v725_v38, %v723_v36  ;;  %v727_v42 = vpop.f32.mrb[74].mxu0 }
 0x246   : > { %v862_v43 = vpop.f32.mrb[63].mxu1  ;;  %v729_v44 = vpop.f32.mrb[75].mxu0 }
 0x247   : > { %1510 = vst.msk [vmem:[%s2216_s27 + $0x220] sm:$0xff] %vm2212_vm3, %v1826_v39  ;;  %v1827_v45 = vpack.c.bf16 %v862_v43, %v860_v40  ;;  %1490 = vst.msk [vmem:[%s2216_s27 + $0x180] sm:$0xff] %vm2212_vm3, %v1806_v41  ;;  %v1807_v46 = vpack.c.bf16 %v729_v44, %v727_v42 }
 0x249   : > { %1511 = vst.msk [vmem:[%s2216_s27 + $0x228] sm:$0xff] %vm2212_vm3, %v1827_v45  ;;  %1491 = vst.msk [vmem:[%s2216_s27 + $0x188] sm:$0xff] %vm2212_vm3, %v1807_v46 }
 0x24b   : > { %v866_v48 = vpop.f32.mrb[64].mxu1  ;;  %v733_v49 = vpop.f32.mrb[76].mxu0 }
 0x24c   : > { %v868_v50 = vpop.f32.mrb[65].mxu1  ;;  %v735_v51 = vpop.f32.mrb[77].mxu0 }
 0x24d   : > { %v1828_v52 = vpack.c.bf16 %v868_v50, %v866_v48  ;;  %v870_v53 = vpop.f32.mrb[66].mxu1  ;;  %v1808_v54 = vpack.c.bf16 %v735_v51, %v733_v49  ;;  %v737_v55 = vpop.f32.mrb[78].mxu0 }
 0x24e   : > { %v872_v56 = vpop.f32.mrb[67].mxu1  ;;  %v739_v57 = vpop.f32.mrb[79].mxu0 }
 0x24f   : > { %1512 = vst.msk [vmem:[%s2216_s27 + $0x230] sm:$0xff] %vm2212_vm3, %v1828_v52  ;;  %v1829_v58 = vpack.c.bf16 %v872_v56, %v870_v53  ;;  %1492 = vst.msk [vmem:[%s2216_s27 + $0x190] sm:$0xff] %vm2212_vm3, %v1808_v54  ;;  %v1809_v59 = vpack.c.bf16 %v739_v57, %v737_v55 }
 0x251   : > { %1513 = vst.msk [vmem:[%s2216_s27 + $0x238] sm:$0xff] %vm2212_vm3, %v1829_v58  ;;  %1493 = vst.msk [vmem:[%s2216_s27 + $0x198] sm:$0xff] %vm2212_vm3, %v1809_v59 }
 0x253   : > { %v876_v60 = vpop.f32.mrb[68].mxu1  ;;  %v743_v61 = vpop.f32.mrb[80].mxu0 }
 0x254   : > { %v878_v62 = vpop.f32.mrb[69].mxu1  ;;  %v745_v63 = vpop.f32.mrb[81].mxu0 }
 0x255   : > { %v1830_v0 = vpack.c.bf16 %v878_v62, %v876_v60  ;;  %v880_v1 = vpop.f32.mrb[70].mxu1  ;;  %v1810_v2 = vpack.c.bf16 %v745_v63, %v743_v61  ;;  %v747_v3 = vpop.f32.mrb[82].mxu0 }
 0x256   : > { %v882_v4 = vpop.f32.mrb[71].mxu1  ;;  %v749_v5 = vpop.f32.mrb[83].mxu0 }
 0x257   : > { %1514 = vst.msk [vmem:[%s2216_s27 + $0x240] sm:$0xff] %vm2212_vm3, %v1830_v0  ;;  %v1831_v6 = vpack.c.bf16 %v882_v4, %v880_v1  ;;  %1494 = vst.msk [vmem:[%s2216_s27 + $0x1a0] sm:$0xff] %vm2212_vm3, %v1810_v2  ;;  %v1811_v7 = vpack.c.bf16 %v749_v5, %v747_v3 }
 0x259   : > { %1515 = vst.msk [vmem:[%s2216_s27 + $0x248] sm:$0xff] %vm2212_vm3, %v1831_v6  ;;  %1495 = vst.msk [vmem:[%s2216_s27 + $0x1a8] sm:$0xff] %vm2212_vm3, %v1811_v7 }
 0x25b   : > { %v886_v8 = vpop.f32.mrb[72].mxu1  ;;  %v753_v9 = vpop.f32.mrb[84].mxu0 }
 0x25c   : > { %v888_v10 = vpop.f32.mrb[73].mxu1  ;;  %v755_v11 = vpop.f32.mrb[85].mxu0 }
 0x25d   : > { %v1832_v12 = vpack.c.bf16 %v888_v10, %v886_v8  ;;  %v890_v13 = vpop.f32.mrb[74].mxu1  ;;  %v1812_v14 = vpack.c.bf16 %v755_v11, %v753_v9  ;;  %v757_v15 = vpop.f32.mrb[86].mxu0 }
 0x25e   : > { %v892_v16 = vpop.f32.mrb[75].mxu1  ;;  %v759_v17 = vpop.f32.mrb[87].mxu0 }
 0x25f   : > { %1516 = vst.msk [vmem:[%s2216_s27 + $0x250] sm:$0xff] %vm2212_vm3, %v1832_v12  ;;  %v1833_v18 = vpack.c.bf16 %v892_v16, %v890_v13  ;;  %1496 = vst.msk [vmem:[%s2216_s27 + $0x1b0] sm:$0xff] %vm2212_vm3, %v1812_v14  ;;  %v1813_v19 = vpack.c.bf16 %v759_v17, %v757_v15 }
 0x261   : > { %1517 = vst.msk [vmem:[%s2216_s27 + $0x258] sm:$0xff] %vm2212_vm3, %v1833_v18  ;;  %1497 = vst.msk [vmem:[%s2216_s27 + $0x1b8] sm:$0xff] %vm2212_vm3, %v1813_v19 }
 0x263   : > { %v896_v20 = vpop.f32.mrb[76].mxu1 }
 0x264   : > { %v898_v21 = vpop.f32.mrb[77].mxu1 }
 0x265   : > { %v1834_v22 = vpack.c.bf16 %v898_v21, %v896_v20  ;;  %v900_v23 = vpop.f32.mrb[78].mxu1 }
 0x266   : > { %v902_v24 = vpop.f32.mrb[79].mxu1 }
 0x267   : > { %1518 = vst.msk [vmem:[%s2216_s27 + $0x260] sm:$0xff] %vm2212_vm3, %v1834_v22  ;;  %v1835_v25 = vpack.c.bf16 %v902_v24, %v900_v23 }
 0x269   : > { %1519 = vst.msk [vmem:[%s2216_s27 + $0x268] sm:$0xff] %vm2212_vm3, %v1835_v25 }
 0x26b   : > { %v906_v26 = vpop.f32.mrb[80].mxu1 }
 0x26c   : > { %v908_v27 = vpop.f32.mrb[81].mxu1 }
 0x26d   : > { %v1836_v28 = vpack.c.bf16 %v908_v27, %v906_v26  ;;  %v910_v29 = vpop.f32.mrb[82].mxu1 }
 0x26e   : > { %v912_v30 = vpop.f32.mrb[83].mxu1 }
 0x26f   : > { %1520 = vst.msk [vmem:[%s2216_s27 + $0x270] sm:$0xff] %vm2212_vm3, %v1836_v28  ;;  %v1837_v31 = vpack.c.bf16 %v912_v30, %v910_v29 }
 0x271   : > { %1521 = vst.msk [vmem:[%s2216_s27 + $0x278] sm:$0xff] %vm2212_vm3, %v1837_v31 }
 0x273   : > { %v916_v32 = vpop.f32.mrb[84].mxu1 }
 0x274   : > { %v918_v33 = vpop.f32.mrb[85].mxu1 }
 0x275   : > { %v1838_v34 = vpack.c.bf16 %v918_v33, %v916_v32  ;;  %v920_v35 = vpop.f32.mrb[86].mxu1 }
 0x276   : > { %v922_v36 = vpop.f32.mrb[87].mxu1 }
 0x277   : > { %1522 = vst.msk [vmem:[%s2216_s27 + $0x280] sm:$0xff] %vm2212_vm3, %v1838_v34  ;;  %v1839_v37 = vpack.c.bf16 %v922_v36, %v920_v35 }
 0x279   : > { %1523 = vst.msk [vmem:[%s2216_s27 + $0x288] sm:$0xff] %vm2212_vm3, %v1839_v37 }
 0x27b   : > { %v926_v38 = vpop.f32.mrb[88].mxu1 }
 0x27c   : > { %v928_v39 = vpop.f32.mrb[89].mxu1 }
 0x27d   : > { %v1840_v40 = vpack.c.bf16 %v928_v39, %v926_v38  ;;  %v930_v41 = vpop.f32.mrb[90].mxu1 }
 0x27e   : > { %v932_v42 = vpop.f32.mrb[91].mxu1 }
 0x27f   : > { %1524 = vst.msk [vmem:[%s2216_s27 + $0x290] sm:$0xff] %vm2212_vm3, %v1840_v40  ;;  %v1841_v43 = vpack.c.bf16 %v932_v42, %v930_v41 }
 0x281   : > { %1525 = vst.msk [vmem:[%s2216_s27 + $0x298] sm:$0xff] %vm2212_vm3, %v1841_v43 }
 0x282   : > { %1919 = shalt.err (!%p1916_p3)
}
 0x283   : > { %s1920_s10 = scalar_lea.hbm %s2469_s5, 10752  ;;  %s1924_s19 = scalar_lea.hbm %s2525_s3, 21504 }
 0x284   : > { %p1921_p4 = scmp.ne.s32.totalorder %s2469_s5, %s1920_s10  ;;  %p1925_p9 = scmp.lt.u32.totalorder %s2469_s5, %s2525_s3 }
 0x285   : > { %p1926_p10 = scmp.lt.u32.totalorder %s1924_s19, %s1920_s10  ;;  %p1928_p12 = scmp.lt.u32.totalorder %s1920_s10, %s2469_s5 }
 0x286   : > { %p1922_p7 = pnand %p1921_p4, %p2032_p5 }
 0x287   : > { %p1927_p11 = por %p1926_p10, %p1925_p9 }
 0x288   : > { %p1923_p8 = pneg %p1922_p7 }
 0x289   : > { %p1929_p13 = por %p1928_p12, %p1927_p11 }
 0x28b   : > { %p1930_p0 = pnand %p1929_p13, %p1923_p8 }
 0x28d   : > { %1933 = shalt.err (!%p1930_p0)
}
 0x28e   : > { %s1972_s25 = smov 128   ;;  %s1973_s26 = smov 8  }
 0x28f   : > { %1846 = dma.vmem_to_hbm [thread:$0]  (%p2032_p5), %s2471_s29, 10752, %s2469_s5, %s2481_s16, %s1972_s25, %s1972_s25, %s1973_s26  }
 0x290 PF: > { %p1853_p1 = scmp.ge.s32.totalorder %s1968_s15, 2  ;;  %s1556_s27 = sand.u32 1, %s1956_s12  }
 0x291   : > { %s1557_s28 = scalar_lea.sflag [#allocation3], %s1556_s27 }
 0x292   : > { %p1849_p2 = pnand %p1853_p1, %p2036_p6 }
 0x294   : > { %1951 = dma.done.wait (!%p1849_p2), %s1557_s28, 10752  }
 0x295   : > { %1953 = vsyncadd (!%p1849_p2), %s1557_s28, 4294956544  ;;  %p13_p3 = scmp.ge.s32.totalorder %s2019_s18, 4   ;;  %s2530_s12 = smov %s1960_s13 }
 0x296   : > { %s2531_s13 = smov %s1964_s14  ;;  %s2532_s14 = smov %s2030_s21 }
 0x297   : > { %s2533_s15 = smov %s2019_s18  ;;  %15 = sbr.rel (!%p13_p3) target bundleno = 3 (0x3), region = 67 }
 0x29e   :  { %1562 = vsyncpa [#allocation3], 1 }
 0x29f   :  { %1564 = vsyncpa [#allocation3 + $0x1], 1 }

</bundles_post_ra>
